<compile_context>
chip_gen: v7x
topology: tpu7x:2x2x1
jax: 0.10.0
libtpu: 0.0.40
codegen_flags: <defaults>
</compile_context>

<pallas_src>
import jax
import jax.numpy as jnp
from jax.experimental import pallas as pl
from jax.experimental.pallas import tpu as pltpu


def continuous_layer_kernel(x_ref, w1_ref, b1_ref, w2_ref, b2_ref, o_ref, h_ref):
    x = x_ref[...]                                            # (TILE_M, Dp), io dtype
    # MXU matmul #1 (compute_dtype operands, f32 accumulation).
    h = jnp.dot(x.astype(w1_ref.dtype), w1_ref[...],
                preferred_element_type=jnp.float32)
    # Bias + relu in f32 on the VPU; store straight into the compute-dtype
    # scratch (identical numerics to casting at the read, half the traffic).
    h_ref[...] = jnp.maximum(h + b1_ref[...], 0.0).astype(h_ref.dtype)
    # MXU matmul #2 (no extra cast on the read: scratch already in MXU dtype).
    f = jnp.dot(h_ref[...], w2_ref[...], preferred_element_type=jnp.float32)
    f = f + b2_ref[...]
    # ContinuousLayer.forward: state + residual_layer(...)[state_symbol]
    o_ref[...] = (x.astype(jnp.float32) + f).astype(o_ref.dtype)
    # TODO(synk): for very large H (compute-bound regime), replace the VMEM h
    # staging with a fori_loop over 128/256-wide H chunks kept in vregs so the
    # two matmuls pipeline back-to-back on the MXU.


def _round_up(v, m):
    return ((v + m - 1) // m) * m


def _vmem_capacity_bytes():
    """Physical VMEM per core; conservative (v7x-sized) fallback."""
    try:
        return int(pltpu.get_tpu_info().vmem_capacity_bytes)
    except Exception:
        return 64 * 1024 * 1024


def _pick_tile_m(m, d_p, h_p, w_bytes, io_bytes, budget):
    """Largest row tile (<=512, >=2 tiles when M allows) fitting the budget."""
    m8 = max(8, _round_up(m, 8))
    # >=2 row tiles so the "parallel" grid axis splits across v7x's two
    # TensorCores (neutral on v5e/v6e: per-step overhead is ~0.35us).
    cap = _round_up(-(-m // 2), 8) if m > 8 else 8
    cap = min(cap, 512, m8)
    need = None
    for tm in (512, 256, 128, 64, 32, 16, 8):
        if tm > cap:
            continue
        need = (2 * tm * d_p * io_bytes          # x tile, double-buffered
                + 2 * tm * d_p * io_bytes        # out tile, double-buffered
                + tm * h_p * w_bytes             # h scratch (compute dtype)
                + 2 * 2 * d_p * h_p * w_bytes    # W1+W2; conservative 2 bufs so
                                                 #  the double-buffer fallback
                                                 #  also fits (Buffered(1) only
                                                 #  adds headroom)
                + 2 * 8 * (h_p + d_p) * 4)       # biases (sublane-padded, f32)
        if need <= budget:
            return tm, need
    return 8, need


def continuous_layer(x, w1, b1, w2, b2, compute_dtype=jnp.bfloat16, io_dtype=None):
    """x: (B, S, D) -> (B, S, D), y = x + MLP(x).

    compute_dtype: MXU operand dtype for the two dots (accumulation, bias,
    relu, skip add always f32).  io_dtype: dtype streamed through HBM for the
    activations/output (default: x.dtype; bf16 halves activation traffic at a
    small numerics cost on the skip-add input).
    """
    B, S, D = x.shape
    H = w1.shape[1]
    M = B * S
    io_dtype = x.dtype if io_dtype is None else jnp.dtype(io_dtype)

    # Lane-dense padding: last dims up to multiples of 128 (exact with zeros).
    Dp = _round_up(D, 128)
    Hp = _round_up(H, 128)

    w_bytes = jnp.dtype(compute_dtype).itemsize
    io_bytes = jnp.dtype(io_dtype).itemsize

    capacity = _vmem_capacity_bytes()
    budget = (3 * capacity) // 4               # ~96 MiB v5e/v6e, ~48 MiB v7x
    TILE_M, vmem_need = _pick_tile_m(M, Dp, Hp, w_bytes, io_bytes, budget)
    Mp = _round_up(M, TILE_M)
    grid_m = Mp // TILE_M

    # Skip the wrapper-side pad / slice (extra HBM passes) when already aligned.
    x2d = x.reshape(M, D)
    if jnp.dtype(io_dtype) != x.dtype:
        x2d = x2d.astype(io_dtype)
    padded = (Mp != M) or (Dp != D)
    if padded:
        x2d = jnp.pad(x2d, ((0, Mp - M), (0, Dp - D)))
    w1_p = jnp.pad(w1, ((0, Dp - D), (0, Hp - H))).astype(compute_dtype)
    w2_p = jnp.pad(w2, ((0, Hp - H), (0, Dp - D))).astype(compute_dtype)
    b1_p = jnp.pad(b1, (0, Hp - H)).reshape(1, Hp).astype(jnp.float32)
    b2_p = jnp.pad(b2, (0, Dp - D)).reshape(1, Dp).astype(jnp.float32)

    # Advisory cost estimate for XLA's scheduler around the custom call.
    flops = 4 * Mp * Dp * Hp                               # two matmuls
    bytes_accessed = (2 * Mp * Dp * io_bytes               # x in + y out
                      + 2 * Dp * Hp * w_bytes              # W1 + W2 (resident)
                      + (Hp + Dp) * 4)                     # biases

    # Always set the scoped-VMEM limit (v5e's default is only 16 MiB); keep
    # >=10% of physical VMEM as headroom for Mosaic internals / semaphores.
    vmem_limit = min(max(int(vmem_need * 1.25), 32 * 1024 * 1024),
                     (9 * capacity) // 10)
    # TODO(synk): for D/H large enough that W1/W2 themselves exceed the budget,
    # add a trailing "arbitrary" K-reduction grid axis with a pl.when-managed
    # f32 accumulator instead of keeping full weights resident.

    def _build(weight_buffers):
        wkw = {}
        if weight_buffers == 1:
            # Resident operands (constant index_map) don't need double buffers.
            wkw = dict(pipeline_mode=pl.Buffered(1))
        return pl.pallas_call(
            continuous_layer_kernel,
            out_shape=jax.ShapeDtypeStruct((Mp, Dp), io_dtype),
            grid_spec=pltpu.PrefetchScalarGridSpec(
                num_scalar_prefetch=0,
                grid=(grid_m,),
                in_specs=[
                    pl.BlockSpec((TILE_M, Dp), lambda i: (i, 0)),        # x
                    pl.BlockSpec((Dp, Hp), lambda i: (0, 0), **wkw),     # W1
                    pl.BlockSpec((1, Hp), lambda i: (0, 0), **wkw),      # b1
                    pl.BlockSpec((Hp, Dp), lambda i: (0, 0), **wkw),     # W2
                    pl.BlockSpec((1, Dp), lambda i: (0, 0), **wkw),      # b2
                ],
                out_specs=pl.BlockSpec((TILE_M, Dp), lambda i: (i, 0)),
                scratch_shapes=[pltpu.VMEM((TILE_M, Hp), compute_dtype)],
            ),
            compiler_params=pltpu.CompilerParams(
                dimension_semantics=("parallel",),
                vmem_limit_bytes=vmem_limit,
            ),
            cost_estimate=pl.CostEstimate(
                flops=flops, transcendentals=0, bytes_accessed=bytes_accessed),
        )

    try:
        out2d = _build(1)(x2d, w1_p, b1_p, w2_p, b2_p)
    except Exception:
        # Fallback if pipeline_mode=pl.Buffered(1) is unsupported on a
        # top-level pallas_call BlockSpec in the installed jax version.
        out2d = _build(2)(x2d, w1_p, b1_p, w2_p, b2_p)

    if padded:
        out2d = out2d[:M, :D]
    return out2d.reshape(B, S, D)


def reference(x, w1, b1, w2, b2):
    h = jnp.maximum(jnp.einsum("bsd,dh->bsh", x, w1) + b1, 0.0)
    f = jnp.einsum("bsh,hd->bsd", h, w2) + b2
    return x + f


if __name__ == "__main__":
    B, S, D, H = 2, 8, 32, 64

    key = jax.random.PRNGKey(0)
    kx, k1, k2, k3, k4 = jax.random.split(key, 5)

    x = jax.random.normal(kx, (B, S, D), dtype=jnp.float32)
    # Deterministic synthetic parameters (no checkpoint load).
    w1 = jax.random.normal(k1, (D, H), dtype=jnp.float32) * 0.05
    b1 = jax.random.normal(k2, (H,), dtype=jnp.float32) * 0.01
    w2 = jax.random.normal(k3, (H, D), dtype=jnp.float32) * 0.05
    b2 = jax.random.normal(k4, (D,), dtype=jnp.float32) * 0.01

    y_ref = reference(x, w1, b1, w2, b2)

    # Full-f32 compute path: exact check.
    y_f32 = continuous_layer(x, w1, b1, w2, b2, compute_dtype=jnp.float32)
    jax.block_until_ready(y_f32)
    assert y_f32.shape == (B, S, D)
    assert jnp.allclose(y_f32, y_ref, atol=1e-5, rtol=1e-5)

    # bf16-matmul / f32-accumulate path (default perf path).
    y_bf16 = continuous_layer(x, w1, b1, w2, b2, compute_dtype=jnp.bfloat16)
    jax.block_until_ready(y_bf16)
    assert y_bf16.shape == (B, S, D)
    assert jnp.allclose(y_bf16, y_ref, atol=2e-2, rtol=2e-2)

    # bf16 I/O mode (halves activation HBM traffic; skip-add input rounded).
    y_io = continuous_layer(x, w1, b1, w2, b2,
                            compute_dtype=jnp.bfloat16, io_dtype=jnp.bfloat16)
    jax.block_until_ready(y_io)
    assert y_io.shape == (B, S, D) and y_io.dtype == jnp.bfloat16
    assert jnp.allclose(y_io.astype(jnp.float32), y_ref, atol=5e-2, rtol=5e-2)

    print("KERNEL_OK")
</pallas_src>

<mosaic_0001>
module attributes {stable_mosaic.version = 11 : i64} {
  func.func @continuous_layer_kernel(%arg0: i32, %arg1: memref<8x128xf32, #tpu.memory_space<vmem>>, %arg2: memref<128x128xf32, #tpu.memory_space<vmem>>, %arg3: memref<1x128xf32, #tpu.memory_space<vmem>>, %arg4: memref<128x128xf32, #tpu.memory_space<vmem>>, %arg5: memref<1x128xf32, #tpu.memory_space<vmem>>, %arg6: memref<8x128xf32, #tpu.memory_space<vmem>>, %arg7: memref<8x128xf32, #tpu.memory_space<vmem>>) attributes {dimension_semantics = [#tpu.dimension_semantics<parallel>], iteration_bounds = array<i64: 2>, scalar_prefetch = 0 : i64, scratch_operands = 1 : i64, tpu.core_type = #tpu.core_type<tc>, window_params = [{transform_indices = @transform_0, window_bounds = array<i64: 8, 128>}, {pipeline_mode = #tpu.pipeline_mode<synchronous>, transform_indices = @transform_1, window_bounds = array<i64: 128, 128>}, {pipeline_mode = #tpu.pipeline_mode<synchronous>, transform_indices = @transform_2, window_bounds = array<i64: 1, 128>}, {pipeline_mode = #tpu.pipeline_mode<synchronous>, transform_indices = @transform_3, window_bounds = array<i64: 128, 128>}, {pipeline_mode = #tpu.pipeline_mode<synchronous>, transform_indices = @transform_4, window_bounds = array<i64: 1, 128>}, {transform_indices = @transform_5, window_bounds = array<i64: 8, 128>}]} {
    %c0 = arith.constant 0 : index
    %c0_0 = arith.constant 0 : index
    %0 = vector.load %arg1[%c0, %c0_0] : memref<8x128xf32, #tpu.memory_space<vmem>>, vector<8x128xf32>
    %c0_1 = arith.constant 0 : index
    %c0_2 = arith.constant 0 : index
    %1 = vector.load %arg2[%c0_1, %c0_2] : memref<128x128xf32, #tpu.memory_space<vmem>>, vector<128x128xf32>
    %cst = arith.constant dense<0.000000e+00> : vector<8x128xf32>
    %2 = tpu.matmul %0, %1, %cst {dimension_numbers = #tpu.dot_dimension_numbers<[1], [0], [0], [1], [0, 0, 1, 1], [], []>} : vector<8x128xf32>, vector<128x128xf32>, vector<8x128xf32> -> vector<8x128xf32>
    %c0_3 = arith.constant 0 : index
    %c0_4 = arith.constant 0 : index
    %3 = vector.load %arg3[%c0_3, %c0_4] : memref<1x128xf32, #tpu.memory_space<vmem>>, vector<1x128xf32>
    %4 = vector.broadcast %3 : vector<1x128xf32> to vector<8x128xf32>
    %5 = arith.addf %2, %4 : vector<8x128xf32>
    %cst_5 = arith.constant 0.000000e+00 : f32
    %6 = vector.broadcast %cst_5 : f32 to vector<8x128xf32>
    %7 = arith.maximumf %5, %6 : vector<8x128xf32>
    %c0_6 = arith.constant 0 : index
    %c0_7 = arith.constant 0 : index
    %8 = vector.load %arg7[%c0_6, %c0_7] : memref<8x128xf32, #tpu.memory_space<vmem>>, vector<8x128xf32>
    tpu.vector_store %arg7[%c0_6, %c0_7], %7 {strides = array<i32>} : memref<8x128xf32, #tpu.memory_space<vmem>>, vector<8x128xf32>,
    %c0_8 = arith.constant 0 : index
    %c0_9 = arith.constant 0 : index
    %9 = vector.load %arg7[%c0_8, %c0_9] : memref<8x128xf32, #tpu.memory_space<vmem>>, vector<8x128xf32>
    %c0_10 = arith.constant 0 : index
    %c0_11 = arith.constant 0 : index
    %10 = vector.load %arg4[%c0_10, %c0_11] : memref<128x128xf32, #tpu.memory_space<vmem>>, vector<128x128xf32>
    %cst_12 = arith.constant dense<0.000000e+00> : vector<8x128xf32>
    %11 = tpu.matmul %9, %10, %cst_12 {dimension_numbers = #tpu.dot_dimension_numbers<[1], [0], [0], [1], [0, 0, 1, 1], [], []>} : vector<8x128xf32>, vector<128x128xf32>, vector<8x128xf32> -> vector<8x128xf32>
    %c0_13 = arith.constant 0 : index
    %c0_14 = arith.constant 0 : index
    %12 = vector.load %arg5[%c0_13, %c0_14] : memref<1x128xf32, #tpu.memory_space<vmem>>, vector<1x128xf32>
    %13 = vector.broadcast %12 : vector<1x128xf32> to vector<8x128xf32>
    %14 = arith.addf %11, %13 : vector<8x128xf32>
    %15 = arith.addf %0, %14 : vector<8x128xf32>
    %c0_15 = arith.constant 0 : index
    %c0_16 = arith.constant 0 : index
    %16 = vector.load %arg6[%c0_15, %c0_16] : memref<8x128xf32, #tpu.memory_space<vmem>>, vector<8x128xf32>
    tpu.vector_store %arg6[%c0_15, %c0_16], %15 {strides = array<i32>} : memref<8x128xf32, #tpu.memory_space<vmem>>, vector<8x128xf32>,
    return
  }
  func.func @transform_0(%arg0: i32) -> (i32, i32) {
    %c0_i32 = arith.constant 0 : i32
    %c0_i32_0 = arith.constant 0 : i32
    return %arg0, %c0_i32 : i32, i32
  }
  func.func @transform_1(%arg0: i32) -> (i32, i32) {
    %c0_i32 = arith.constant 0 : i32
    %c0_i32_0 = arith.constant 0 : i32
    %c0_i32_1 = arith.constant 0 : i32
    return %c0_i32, %c0_i32_0 : i32, i32
  }
  func.func @transform_2(%arg0: i32) -> (i32, i32) {
    %c0_i32 = arith.constant 0 : i32
    %c0_i32_0 = arith.constant 0 : i32
    %c0_i32_1 = arith.constant 0 : i32
    return %c0_i32, %c0_i32_0 : i32, i32
  }
  func.func @transform_3(%arg0: i32) -> (i32, i32) {
    %c0_i32 = arith.constant 0 : i32
    %c0_i32_0 = arith.constant 0 : i32
    %c0_i32_1 = arith.constant 0 : i32
    return %c0_i32, %c0_i32_0 : i32, i32
  }
  func.func @transform_4(%arg0: i32) -> (i32, i32) {
    %c0_i32 = arith.constant 0 : i32
    %c0_i32_0 = arith.constant 0 : i32
    %c0_i32_1 = arith.constant 0 : i32
    return %c0_i32, %c0_i32_0 : i32, i32
  }
  func.func @transform_5(%arg0: i32) -> (i32, i32) {
    %c0_i32 = arith.constant 0 : i32
    %c0_i32_0 = arith.constant 0 : i32
    return %arg0, %c0_i32 : i32, i32
  }
}

module attributes {stable_mosaic.version = 11 : i64} {
  func.func @continuous_layer_kernel(%arg0: i32, %arg1: memref<8x128xf32, #tpu.memory_space<vmem>>, %arg2: memref<128x128xf32, #tpu.memory_space<vmem>>, %arg3: memref<1x128xf32, #tpu.memory_space<vmem>>, %arg4: memref<128x128xf32, #tpu.memory_space<vmem>>, %arg5: memref<1x128xf32, #tpu.memory_space<vmem>>, %arg6: memref<8x128xf32, #tpu.memory_space<vmem>>, %arg7: memref<8x128xf32, #tpu.memory_space<vmem>>) attributes {dimension_semantics = [#tpu.dimension_semantics<parallel>], iteration_bounds = array<i64: 2>, scalar_prefetch = 0 : i64, scratch_operands = 1 : i64, tpu.core_type = #tpu.core_type<tc>, window_params = [{transform_indices = @transform_0, window_bounds = array<i64: 8, 128>}, {pipeline_mode = #tpu.pipeline_mode<synchronous>, transform_indices = @transform_1, window_bounds = array<i64: 128, 128>}, {pipeline_mode = #tpu.pipeline_mode<synchronous>, transform_indices = @transform_2, window_bounds = array<i64: 1, 128>}, {pipeline_mode = #tpu.pipeline_mode<synchronous>, transform_indices = @transform_3, window_bounds = array<i64: 128, 128>}, {pipeline_mode = #tpu.pipeline_mode<synchronous>, transform_indices = @transform_4, window_bounds = array<i64: 1, 128>}, {transform_indices = @transform_5, window_bounds = array<i64: 8, 128>}]} {
    %c0 = arith.constant 0 : index
    %c0_0 = arith.constant 0 : index
    %0 = vector.load %arg1[%c0, %c0_0] : memref<8x128xf32, #tpu.memory_space<vmem>>, vector<8x128xf32>
    %c0_1 = arith.constant 0 : index
    %c0_2 = arith.constant 0 : index
    %1 = vector.load %arg2[%c0_1, %c0_2] : memref<128x128xf32, #tpu.memory_space<vmem>>, vector<128x128xf32>
    %cst = arith.constant dense<0.000000e+00> : vector<8x128xf32>
    %2 = tpu.matmul %0, %1, %cst {dimension_numbers = #tpu.dot_dimension_numbers<[1], [0], [0], [1], [0, 0, 1, 1], [], []>} : vector<8x128xf32>, vector<128x128xf32>, vector<8x128xf32> -> vector<8x128xf32>
    %c0_3 = arith.constant 0 : index
    %c0_4 = arith.constant 0 : index
    %3 = vector.load %arg3[%c0_3, %c0_4] : memref<1x128xf32, #tpu.memory_space<vmem>>, vector<1x128xf32>
    %4 = vector.broadcast %3 : vector<1x128xf32> to vector<8x128xf32>
    %5 = arith.addf %2, %4 : vector<8x128xf32>
    %cst_5 = arith.constant 0.000000e+00 : f32
    %6 = vector.broadcast %cst_5 : f32 to vector<8x128xf32>
    %7 = arith.maximumf %5, %6 : vector<8x128xf32>
    %c0_6 = arith.constant 0 : index
    %c0_7 = arith.constant 0 : index
    %8 = vector.load %arg7[%c0_6, %c0_7] : memref<8x128xf32, #tpu.memory_space<vmem>>, vector<8x128xf32>
    tpu.vector_store %arg7[%c0_6, %c0_7], %7 {strides = array<i32>} : memref<8x128xf32, #tpu.memory_space<vmem>>, vector<8x128xf32>,
    %c0_8 = arith.constant 0 : index
    %c0_9 = arith.constant 0 : index
    %9 = vector.load %arg7[%c0_8, %c0_9] : memref<8x128xf32, #tpu.memory_space<vmem>>, vector<8x128xf32>
    %c0_10 = arith.constant 0 : index
    %c0_11 = arith.constant 0 : index
    %10 = vector.load %arg4[%c0_10, %c0_11] : memref<128x128xf32, #tpu.memory_space<vmem>>, vector<128x128xf32>
    %cst_12 = arith.constant dense<0.000000e+00> : vector<8x128xf32>
    %11 = tpu.matmul %9, %10, %cst_12 {dimension_numbers = #tpu.dot_dimension_numbers<[1], [0], [0], [1], [0, 0, 1, 1], [], []>} : vector<8x128xf32>, vector<128x128xf32>, vector<8x128xf32> -> vector<8x128xf32>
    %c0_13 = arith.constant 0 : index
    %c0_14 = arith.constant 0 : index
    %12 = vector.load %arg5[%c0_13, %c0_14] : memref<1x128xf32, #tpu.memory_space<vmem>>, vector<1x128xf32>
    %13 = vector.broadcast %12 : vector<1x128xf32> to vector<8x128xf32>
    %14 = arith.addf %11, %13 : vector<8x128xf32>
    %15 = arith.addf %0, %14 : vector<8x128xf32>
    %c0_15 = arith.constant 0 : index
    %c0_16 = arith.constant 0 : index
    %16 = vector.load %arg6[%c0_15, %c0_16] : memref<8x128xf32, #tpu.memory_space<vmem>>, vector<8x128xf32>
    tpu.vector_store %arg6[%c0_15, %c0_16], %15 {strides = array<i32>} : memref<8x128xf32, #tpu.memory_space<vmem>>, vector<8x128xf32>,
    return
  }
  func.func @transform_0(%arg0: i32) -> (i32, i32) {
    %c0_i32 = arith.constant 0 : i32
    %c0_i32_0 = arith.constant 0 : i32
    return %arg0, %c0_i32 : i32, i32
  }
  func.func @transform_1(%arg0: i32) -> (i32, i32) {
    %c0_i32 = arith.constant 0 : i32
    %c0_i32_0 = arith.constant 0 : i32
    %c0_i32_1 = arith.constant 0 : i32
    return %c0_i32, %c0_i32_0 : i32, i32
  }
  func.func @transform_2(%arg0: i32) -> (i32, i32) {
    %c0_i32 = arith.constant 0 : i32
    %c0_i32_0 = arith.constant 0 : i32
    %c0_i32_1 = arith.constant 0 : i32
    return %c0_i32, %c0_i32_0 : i32, i32
  }
  func.func @transform_3(%arg0: i32) -> (i32, i32) {
    %c0_i32 = arith.constant 0 : i32
    %c0_i32_0 = arith.constant 0 : i32
    %c0_i32_1 = arith.constant 0 : i32
    return %c0_i32, %c0_i32_0 : i32, i32
  }
  func.func @transform_4(%arg0: i32) -> (i32, i32) {
    %c0_i32 = arith.constant 0 : i32
    %c0_i32_0 = arith.constant 0 : i32
    %c0_i32_1 = arith.constant 0 : i32
    return %c0_i32, %c0_i32_0 : i32, i32
  }
  func.func @transform_5(%arg0: i32) -> (i32, i32) {
    %c0_i32 = arith.constant 0 : i32
    %c0_i32_0 = arith.constant 0 : i32
    return %arg0, %c0_i32 : i32, i32
  }
}

</mosaic_0001>

<bundles_post_ra>
// kernel: tpu_custom_call.1
= control target key start
LH: loop header
LB: loop body
LE: loop exit
PB: predicated region body
PF: predicated region fallthrough
CT: control target
= control target key end

     0   :  { %10 = vsyncpa [#allocation4], 0  ;;  %s1261_s0 = inlined_call_operand.hbm [shape: f32[16,128], index: 0, kind: input, shape index: {}]   ;;  %s1262_s1 = inlined_call_operand.hbm [shape: f32[128,128], index: 1, kind: input, shape index: {}]   ;;  %s1263_s2 = inlined_call_operand.vmem [shape: f32[1,128], index: 2, kind: input, shape index: {}]   ;;  %s1264_s3 = inlined_call_operand.hbm [shape: f32[128,128], index: 3, kind: input, shape index: {}]   ;;  %s1265_s4 = inlined_call_operand.vmem [shape: f32[1,128], index: 4, kind: input, shape index: {}]   ;;  %s1266_s5 = inlined_call_operand.hbm [shape: f32[16,128], index: 5, kind: output, shape index: {}]  }
   0x1   :  { %12 = vsyncpa [#allocation4 + $0x1], 0 }
   0x2   :  { %13 = vsyncpa [#allocation7], 0 }
   0x3   :  { %14 = vsyncpa [#allocation5], 0 }
   0x4   :  { %16 = vsyncpa [#allocation5 + $0x1], 0  ;;  %s1003_s18 = smov 0   ;;  %s1005_s19 = smov 0  }
   0x5   :  { %s1007_s20 = smov 0   ;;  %s1009_s21 = smov 0  }
   0x6 LB: > { %s1024_s22 = sadd.s32 4294967295, %s962_s21   ;;  %s564_s23 = sadd.s32 4294967294, %s962_s21   ;;  %s962_s21 = sphi %s1009_s21, %s1286_s21   ;;  %s958_s20 = sphi %s1007_s20, %s1285_s20   ;;  %s954_s19 = sphi %s1005_s19, %s1284_s19   ;;  %s950_s18 = sphi %s1003_s18, %s1283_s18  }
   0x7   : > { %p42_p0 = scmp.ne.s32.totalorder %s954_s19, %s950_s18  ;;  %p1267_p1 = scmp.eq.s32.totalorder %s1024_s22, 0 }
   0x8   : > { %p156_p3 = scmp.eq.s32.totalorder %s564_s23, 1  ;;  %p565_p5 = scmp.ge.s32.totalorder %s962_s21, 1 }
   0x9   : > { %p1033_p4 = por %p1267_p1, %p42_p0  ;;  %p163_p7 = scmp.lt.s32.totalorder %s962_s21, 3 }
   0xa   : > { %p1038_p6 = por %p156_p3, %p42_p0  ;;  %s964_s27 = smov [#allocation6]  }
   0xb   : > { %s1270_s24 = scalar_select %p1033_p4, 1, 0 }
   0xc   : > { %s1271_s25 = scalar_select %p1038_p6, 1, 0 }
   0xd   : > { %p1043_p8 = pnand %p565_p5, %p163_p7  ;;  %s175_s28 = sshll.u32 %s964_s27, 4  ;;  %s1047_s28 = int_to_ptr.vmem [resolvable:$true] %s175_s28 }
   0xe   : > { %s965_s30 = smov [#allocation8]   ;;  %s806_s9 = scalar_lea.hbm %s1262_s1, 2048 }
   0xf   : > { %p746_p9 = pneg %p1043_p8  ;;  %s191_s6 = sshll.u32 %s965_s30, 4  ;;  %s1058_s6 = int_to_ptr.vmem [resolvable:$true] %s191_s6 }
  0x10   : > { %p807_p12 = scmp.ne.s32.totalorder %s1262_s1, %s806_s9  ;;  %p813_p5 = scmp.lt.u32.totalorder %s806_s9, %s1262_s1 }
  0x11   : > { %p1054_p11 = pnand %p746_p9, %p1267_p1 }
  0x13   : > { %p808_p13 = pneg %p1054_p11 }
  0x15   : > { %p809_p0 = pnand %p808_p13, %p807_p12 }
  0x17   : > { %p810_p3 = pneg %p809_p0 }
  0x19   : > { %p815_p7 = pnand %p813_p5, %p810_p3 }
  0x1b   : > { %818 = shalt.err (!%p815_p7)
}
  0x1c   : > { %s819_s14 = scalar_lea.vmem %s1047_s28, 2048  ;;  %p827_p2 = scmp.lt.s32.totalorder %s1047_s28, %s1047_s28 }
  0x1d   : > { %p820_p9 = scmp.ne.s32.totalorder %s1047_s28, %s819_s14  ;;  %p828_p12 = scmp.lt.s32.totalorder %s819_s14, %s819_s14 }
  0x1f   : > { %p822_p10 = pnand %p820_p9, %p808_p13  ;;  %p829_p0 = por %p828_p12, %p827_p2 }
  0x21   : > { %p823_p1 = pneg %p822_p10 }
  0x23   : > { %p830_p6 = pnand %p829_p0, %p823_p1 }
  0x25   : > { %833 = shalt.err (!%p830_p6)
}
  0x26   : > { %s966_s15 = smov 128   ;;  %s967_s16 = smov 8  }
  0x27   : > { %749 = dma.hbm_to_vmem [thread:$0]  (!%p1054_p11), %s1262_s1, 2048, %s1047_s28, [#allocation7], %s966_s15, %s966_s15, %s967_s16  }
  0x28   : > { %s834_s7 = scalar_lea.hbm %s1264_s3, 2048 }
  0x29   : > { %p835_p2 = scmp.ne.s32.totalorder %s1264_s3, %s834_s7  ;;  %p841_p10 = scmp.lt.u32.totalorder %s834_s7, %s1264_s3 }
  0x2b   : > { %p837_p1 = pnand %p835_p2, %p808_p13 }
  0x2d   : > { %p838_p6 = pneg %p837_p1 }
  0x2f   : > { %p843_p3 = pnand %p841_p10, %p838_p6 }
  0x31   : > { %846 = shalt.err (!%p843_p3)
}
  0x32   : > { %s847_s28 = scalar_lea.vmem %s1058_s6, 2048  ;;  %p855_p12 = scmp.lt.s32.totalorder %s1058_s6, %s1058_s6 }
  0x33   : > { %p848_p5 = scmp.ne.s32.totalorder %s1058_s6, %s847_s28  ;;  %p856_p0 = scmp.lt.s32.totalorder %s847_s28, %s847_s28 }
  0x35   : > { %p850_p7 = pnand %p848_p5, %p808_p13  ;;  %p857_p2 = por %p856_p0, %p855_p12 }
  0x37   : > { %p851_p9 = pneg %p850_p7 }
  0x39   : > { %p858_p1 = pnand %p857_p2, %p851_p9 }
  0x3b   : > { %861 = shalt.err (!%p858_p1)
}
  0x3c   : > { %752 = dma.hbm_to_vmem [thread:$0]  (!%p1054_p11), %s1264_s3, 2048, %s1058_s6, [#allocation7], %s966_s15, %s966_s15, %s967_s16  }
  0x3d   : > { %s1113_s14 = sadd.s32 1, %s962_s21   ;;  %s29_s29 = sadd.s32 1, %s958_s20 }
  0x3e   : > { %s26_s17 = ssub.s32 %s962_s21, %s1113_s14  ;;  %p36_p13 = scmp.ne.s32.totalorder %s958_s20, %s954_s19 }
  0x3f   : > { %p27_p6 = scmp.eq.s32.totalorder %s26_s17, 0  ;;  %p37_p10 = scmp.eq.s32.totalorder %s962_s21, 0 }
  0x40   : > { %p1274_p3 = scmp.eq.s32.totalorder %s1024_s22, 1  ;;  %p763_p7 = scmp.lt.s32.totalorder %s962_s21, 2 }
  0x41   : > { %s1129_s27 = scalar_select %p27_p6, %s958_s20, %s29_s29  }
  0x42   : > { %p1123_p5 = por %p1274_p3, %p36_p13  ;;  %p38_p9 = por %p37_p10, %p36_p13 }
  0x43   : > { %s208_s30 = sand.u32 1, %s958_s20   ;;  %s570_s6 = sshll.u32 %s962_s21, 7 }
  0x44   : > { %s1275_s23 = scalar_select %p1123_p5, 1, 0 }
  0x45   : > { %s569_s7 = sshll.u32 %s208_s30, 3  ;;  %s1136_s8 = scalar_lea.hbm %s1261_s0, %s570_s6 }
  0x46   : > { %s212_s9 = scalar_lea.vmem [#allocation3], %s569_s7  ;;  %p1140_p11 = pnand %p763_p7, %p38_p9 }
  0x47   : > { %s219_s10 = sshll.u32 %s212_s9, 4  ;;  %s209_s28 = scalar_lea.sflag [#allocation4], %s208_s30  ;;  %s1138_s10 = int_to_ptr.vmem [resolvable:$true] %s219_s10 }
  0x48   : > { %s862_s12 = scalar_lea.hbm %s1136_s8, 128  ;;  %p864_p0 = pneg %p1140_p11 }
  0x49   : > { %p863_p12 = scmp.ne.s32.totalorder %s1136_s8, %s862_s12  ;;  %s867_s17 = scalar_lea.hbm %s1261_s0, 256 }
  0x4a   : > { %p868_p13 = scmp.lt.u32.totalorder %s1136_s8, %s1261_s0  ;;  %p869_p6 = scmp.lt.u32.totalorder %s867_s17, %s862_s12 }
  0x4b   : > { %p865_p2 = pnand %p864_p0, %p863_p12  ;;  %p871_p3 = scmp.lt.u32.totalorder %s862_s12, %s1136_s8 }
  0x4c   : > { %p870_p10 = por %p869_p6, %p868_p13 }
  0x4d   : > { %p866_p1 = pneg %p865_p2 }
  0x4e   : > { %p872_p7 = por %p871_p3, %p870_p10 }
  0x50   : > { %p873_p9 = pnand %p872_p7, %p866_p1 }
  0x52   : > { %876 = shalt.err (!%p873_p9)
}
  0x53   : > { %s877_s30 = scalar_lea.vmem %s1138_s10, 128  ;;  %s968_s15 = smov [#allocation3]  }
  0x54   : > { %p878_p12 = scmp.ne.s32.totalorder %s1138_s10, %s877_s30  ;;  %s882_s16 = sshll.u32 %s968_s15, 4  ;;  %s883_s16 = int_to_ptr.vmem [resolvable:$false] %s882_s16 }
  0x55   : > { %s884_s9 = scalar_lea.vmem %s883_s16, 256  ;;  %p885_p4 = scmp.lt.s32.totalorder %s1138_s10, %s883_s16 }
  0x56   : > { %p880_p2 = pnand %p878_p12, %p864_p0  ;;  %p886_p13 = scmp.lt.s32.totalorder %s884_s9, %s877_s30 }
  0x58   : > { %p881_p5 = pneg %p880_p2  ;;  %p887_p6 = por %p886_p13, %p885_p4 }
  0x5a   : > { %p888_p10 = pnand %p887_p6, %p881_p5 }
  0x5c   : > { %891 = shalt.err (!%p888_p10)
}
  0x5d   : > { %756 = dma.hbm_to_vmem [thread:$0]  (!%p1140_p11), %s1136_s8, 128, %s1138_s10, %s209_s28  }
  0x5e   : > { %228 = sbr.rel (%p1043_p8) target bundleno = 585 (0x249), region = 40  ;;  %s1172_s12 = sand.u32 (!%p1043_p8), 1, %s954_s19  }
  0x5f   : > { %s572_s13 = sshll.u32 (!%p1043_p8), %s1172_s12, 3  ;;  %s231_s29 = scalar_lea.sflag (!%p1043_p8), [#allocation4], %s1172_s12 }
  0x60   : > { %s1178_s17 = scalar_lea.vmem (!%p1043_p8), [#allocation3], %s572_s13  ;;  %p1277_p4 = scmp.ne.s32.totalorder (!%p1043_p8), %s1270_s24, 0 }
  0x65   : > { %937 = dma.done.wait (%p1277_p4), %s231_s29, 128  }
  0x66   : > { %939 = vsyncadd (%p1277_p4), %s231_s29, 4294967168  ;;  %p1278_p5 = scmp.eq.s32.totalorder %s1024_s22, 0 }
  0x68   : > { %941 = dma.done.wait (%p1278_p5), [#allocation7], 4096   ;;  %p1279_p8 = pmov %p1278_p5 }
  0x69   : > { %v969_v0 = vmov 0.0|0.0   ;;  %vm970_vm0 = vmmov 0   ;;  %v971_v1 = vmov 0.0   ;;  %v270_v2 = vld [vmem:[#allocation6] sm:$0xff]  ;;  %v271_v3 = vld [vmem:[#allocation6 + $0x8] sm:$0xff]  ;;  %v272_v4 = vld [vmem:[#allocation6 + $0x10] sm:$0xff] }
  0x6a   : > { %943 = vsyncadd (%p1279_p8), [#allocation7], 4294963200  ;;  %686 = vmatprep.subr.bf16.mxu0 %v969_v0  ;;  %648 = vmatprep.mubr.msk.f32.mxu0 %vm970_vm0, %v971_v1  ;;  %v687_v5 = vpack.c.bf16 %v271_v3, %v270_v2  ;;  %v273_v6 = vld [vmem:[#allocation6 + $0x18] sm:$0xff]  ;;  %v274_v8 = vld [vmem:[#allocation6 + $0x20] sm:$0xff]  ;;  %s579_s11 = sshll.u32 %s1024_s22, 7  ;;  %s268_s28 = scalar_lea.vmem [#allocation9], %s572_s13 }
  0x6b   : > { %710 = vmatprep.subr.bf16.mxu1 %v969_v0  ;;  %683 = vmatprep.mubr.msk.f32.mxu1 %vm970_vm0, %v971_v1  ;;  %v690_v7 = vpack.c.bf16 %v273_v6, %v272_v4  ;;  %v275_v9 = vld [vmem:[#allocation6 + $0x28] sm:$0xff]  ;;  %v366_v10 = vld [vmem:[#allocation8] sm:$0xff]  ;;  %v368_v12 = vld [vmem:[#allocation8 + $0x10] sm:$0xff]  ;;  %s475_s7 = sshll.u32 %s268_s28, 4  ;;  %s1217_s15 = scalar_lea.hbm %s1266_s5, %s579_s11  ;;  %s1219_s7 = int_to_ptr.vmem [resolvable:$true] %s475_s7 }
  0x6c   : > { %688 = vmatpush3.bf16.msra.mxu0 %v687_v5  ;;  %v367_v11 = vld [vmem:[#allocation8 + $0x8] sm:$0xff]  ;;  %v369_v13 = vld [vmem:[#allocation8 + $0x18] sm:$0xff]  ;;  %v693_v14 = vpack.c.bf16 %v275_v9, %v274_v8  ;;  %v276_v16 = vld [vmem:[#allocation6 + $0x30] sm:$0xff]  ;;  %s462_s16 = scalar_lea.sflag [#allocation5], %s1172_s12  ;;  %s892_s9 = scalar_lea.vmem %s1219_s7, 128 }
  0x6d   : > { %689 = vmatprep.subr.bf16.mxu0 %v969_v0  ;;  %v711_v15 = vpack.c.bf16 %v367_v11, %v366_v10  ;;  %v277_v17 = vld [vmem:[#allocation6 + $0x38] sm:$0xff]  ;;  %v714_v18 = vpack.c.bf16 %v369_v13, %v368_v12  ;;  %v370_v19 = vld [vmem:[#allocation8 + $0x20] sm:$0xff]  ;;  %v371_v20 = vld [vmem:[#allocation8 + $0x28] sm:$0xff]  ;;  %p893_p11 = scmp.ne.s32.totalorder %s1219_s7, %s892_s9  ;;  %p1280_p0 = scmp.ne.s32.totalorder %s1275_s23, 0 }
  0x6e   : > { %v696_v21 = vpack.c.bf16 %v277_v17, %v276_v16  ;;  %v278_v22 = vld [vmem:[#allocation6 + $0x40] sm:$0xff]  ;;  %v279_v23 = vld [vmem:[#allocation6 + $0x48] sm:$0xff]  ;;  %v717_v24 = vpack.c.bf16 %v371_v20, %v370_v19  ;;  %v372_v25 = vld [vmem:[#allocation8 + $0x30] sm:$0xff]  ;;  %s972_s22 = smov [#allocation9]  }
  0x6f   : > { %712 = vmatpush3.bf16.msra.mxu1 %v711_v15  ;;  %v373_v26 = vld [vmem:[#allocation8 + $0x38] sm:$0xff]  ;;  %v699_v27 = vpack.c.bf16 %v279_v23, %v278_v22  ;;  %v280_v28 = vld [vmem:[#allocation6 + $0x50] sm:$0xff]  ;;  %v374_v31 = vld [vmem:[#allocation8 + $0x40] sm:$0xff]  ;;  %p894_p1 = pnand %p893_p11, %p1280_p0  ;;  %s896_s13 = sshll.u32 %s972_s22, 4  ;;  %s897_s13 = int_to_ptr.vmem [resolvable:$false] %s896_s13 }
  0x70   : > { %691 = vmatpush3.bf16.msra.mxu0 %v690_v7  ;;  %713 = vmatprep.subr.bf16.mxu1 %v969_v0  ;;  %v281_v29 = vld [vmem:[#allocation6 + $0x58] sm:$0xff]  ;;  %v720_v30 = vpack.c.bf16 %v373_v26, %v372_v25  ;;  %v375_v32 = vld [vmem:[#allocation8 + $0x48] sm:$0xff]  ;;  %v282_v34 = vld [vmem:[#allocation6 + $0x60] sm:$0xff]  ;;  %s898_s29 = scalar_lea.vmem %s897_s13, 256  ;;  %p899_p7 = scmp.lt.s32.totalorder %s1219_s7, %s897_s13 }
  0x71   : > { %692 = vmatprep.subr.bf16.mxu0 %v969_v0  ;;  %v702_v33 = vpack.c.bf16 %v281_v29, %v280_v28  ;;  %v283_v35 = vld [vmem:[#allocation6 + $0x68] sm:$0xff]  ;;  %v723_v36 = vpack.c.bf16 %v375_v32, %v374_v31  ;;  %v376_v37 = vld [vmem:[#allocation8 + $0x50] sm:$0xff]  ;;  %v377_v38 = vld [vmem:[#allocation8 + $0x58] sm:$0xff]  ;;  %p895_p3 = pneg %p894_p1  ;;  %p900_p9 = scmp.lt.s32.totalorder %s898_s29, %s892_s9 }
  0x72   : > { %v705_v39 = vpack.c.bf16 %v283_v35, %v282_v34  ;;  %v284_v40 = vld [vmem:[#allocation6 + $0x70] sm:$0xff]  ;;  %v285_v41 = vld [vmem:[#allocation6 + $0x78] sm:$0xff]  ;;  %v726_v42 = vpack.c.bf16 %v377_v38, %v376_v37  ;;  %v378_v43 = vld [vmem:[#allocation8 + $0x60] sm:$0xff] }
  0x73   : > { %715 = vmatpush3.bf16.msra.mxu1 %v714_v18  ;;  %v379_v44 = vld [vmem:[#allocation8 + $0x68] sm:$0xff]  ;;  %v708_v45 = vpack.c.bf16 %v285_v41, %v284_v40  ;;  %v269_v47 = vld [vmem:[%s1178_s17] sm:$0xff]  ;;  %p901_p12 = por %p900_p9, %p899_p7 }
  0x74   : > { %694 = vmatpush3.bf16.msra.mxu0 %v693_v14  ;;  %716 = vmatprep.subr.bf16.mxu1 %v969_v0  ;;  %v729_v46 = vpack.c.bf16 %v379_v44, %v378_v43  ;;  %v380_v48 = vld [vmem:[#allocation8 + $0x70] sm:$0xff]  ;;  %v381_v49 = vld [vmem:[#allocation8 + $0x78] sm:$0xff] }
  0x75   : > { %695 = vmatprep.subr.bf16.mxu0 %v969_v0  ;;  %v732_v50 = vpack.c.bf16 %v381_v49, %v380_v48  ;;  %v576_v51 = vld [vmem:[%s1263_s2] ss:$0 sm:$0xff]  ;;  %p902_p2 = pnand %p901_p12, %p895_p3 }
  0x76   : > { %v577_v56 = vld [vmem:[%s1265_s4] ss:$0 sm:$0xff] }
  0x77   : > { %718 = vmatpush3.bf16.msra.mxu1 %v717_v24 }
  0x78   : > { %697 = vmatpush3.bf16.msra.mxu0 %v696_v21  ;;  %719 = vmatprep.subr.bf16.mxu1 %v969_v0 }
  0x79   : > { %698 = vmatprep.subr.bf16.mxu0 %v969_v0 }
  0x7b   : > { %721 = vmatpush3.bf16.msra.mxu1 %v720_v30 }
  0x7c   : > { %700 = vmatpush3.bf16.msra.mxu0 %v699_v27  ;;  %722 = vmatprep.subr.bf16.mxu1 %v969_v0 }
  0x7d   : > { %701 = vmatprep.subr.bf16.mxu0 %v969_v0 }
  0x7f   : > { %724 = vmatpush3.bf16.msra.mxu1 %v723_v36 }
  0x80   : > { %703 = vmatpush3.bf16.msra.mxu0 %v702_v33  ;;  %725 = vmatprep.subr.bf16.mxu1 %v969_v0 }
  0x81   : > { %704 = vmatprep.subr.bf16.mxu0 %v969_v0 }
  0x83   : > { %727 = vmatpush3.bf16.msra.mxu1 %v726_v42 }
  0x84   : > { %706 = vmatpush3.bf16.msra.mxu0 %v705_v39  ;;  %728 = vmatprep.subr.bf16.mxu1 %v969_v0 }
  0x85   : > { %707 = vmatprep.subr.bf16.mxu0 %v969_v0 }
  0x87   : > { %730 = vmatpush3.bf16.msra.mxu1 %v729_v46 }
  0x88   : > { %709 = vmatpush3.bf16.msra.mxu0 %v708_v45  ;;  %731 = vmatprep.subr.bf16.mxu1 %v969_v0 }
  0x8b   : > { %649 = vmatmul.mubr.f32.vlgmr.msra.gmra.mrb[0].mxu0 %v269_v47  ;;  %733 = vmatpush3.bf16.msra.mxu1 %v732_v50 }
 0x15e   : > { %v359_v52 = vpop.f32.mrb[0].mxu0 }
 0x15f   : > { %v360_v53 = vadd.f32 %v576_v51, %v359_v52  ;;  %v650_v54 = vpop.f32.mrb[1].mxu0 }
 0x161   : > { %v363_v55 = vmax.f32 %v360_v53, 0.0 }
 0x163   : > { %684 = vmatmul.mubr.f32.vlgmr.msra.gmra.mrb[0].mxu1 %v363_v55 }
 0x236   : > { %v455_v57 = vpop.f32.mrb[0].mxu1 }
 0x237   : > { %v456_v58 = vadd.f32 %v577_v56, %v455_v57  ;;  %v685_v59 = vpop.f32.mrb[1].mxu1 }
 0x239   : > { %v459_v60 = vadd.f32 %v456_v58, %v269_v47 }
 0x23b   : > { %460 = vst [vmem:[%s268_s28] sm:$0xff] %v459_v60 }
 0x23c   : > { %905 = shalt.err (!%p902_p2)
}
 0x23d   : > { %s906_s12 = scalar_lea.hbm %s1217_s15, 128  ;;  %s910_s26 = scalar_lea.hbm %s1266_s5, 256 }
 0x23e   : > { %p907_p13 = scmp.ne.s32.totalorder %s1217_s15, %s906_s12  ;;  %p911_p4 = scmp.lt.u32.totalorder %s1217_s15, %s1266_s5 }
 0x23f   : > { %p912_p5 = scmp.lt.u32.totalorder %s910_s26, %s906_s12  ;;  %p914_p11 = scmp.lt.u32.totalorder %s906_s12, %s1217_s15 }
 0x240   : > { %p908_p6 = pnand %p907_p13, %p1280_p0 }
 0x241   : > { %p913_p8 = por %p912_p5, %p911_p4 }
 0x242   : > { %p909_p10 = pneg %p908_p6 }
 0x243   : > { %p915_p1 = por %p914_p11, %p913_p8 }
 0x245   : > { %p916_p3 = pnand %p915_p1, %p909_p10 }
 0x247   : > { %919 = shalt.err (!%p916_p3)
}
 0x248   : > { %744 = dma.vmem_to_hbm [thread:$0]  (%p1280_p0), %s1219_s7, 128, %s1217_s15, %s462_s16  }
 0x249 PF: > { %s487_s11 = sand.u32 1, %s950_s18   ;;  %p1281_p7 = scmp.ne.s32.totalorder %s1271_s25, 0 }
 0x24a   : > { %p1282_p9 = scmp.ge.s32.totalorder %s962_s21, 2  ;;  %s488_s28 = scalar_lea.sflag [#allocation5], %s487_s11 }
 0x24c   : > { %p758_p12 = pnand %p1282_p9, %p1281_p7 }
 0x24e   : > { %945 = dma.done.wait (!%p758_p12), %s488_s28, 128  }
 0x24f   : > { %947 = vsyncadd (!%p758_p12), %s488_s28, 4294967168  ;;  %p19_p2 = scmp.ge.s32.totalorder %s1113_s14, 4   ;;  %s1283_s18 = smov %s954_s19 }
 0x250   : > { %s1284_s19 = smov %s958_s20  ;;  %s1285_s20 = smov %s1129_s27 }
 0x251   : > { %s1286_s21 = smov %s1113_s14  ;;  %21 = sbr.rel (!%p19_p2) target bundleno = 6 (0x6), region = 93 }
 0x258   :  { %493 = vsyncpa [#allocation4], 1 }
 0x259   :  { %495 = vsyncpa [#allocation4 + $0x1], 1 }
 0x25a   :  { %496 = vsyncpa [#allocation7], 1 }
 0x25b   :  { %497 = vsyncpa [#allocation5], 1 }
 0x25c   :  { %499 = vsyncpa [#allocation5 + $0x1], 1 }

// kernel: tpu_custom_call.1
= control target key start
LH: loop header
LB: loop body
LE: loop exit
PB: predicated region body
PF: predicated region fallthrough
CT: control target
= control target key end

     0   :  { %10 = vsyncpa [#allocation4], 0  ;;  %s1261_s0 = inlined_call_operand.hbm [shape: f32[16,128], index: 0, kind: input, shape index: {}]   ;;  %s1262_s1 = inlined_call_operand.hbm [shape: f32[128,128], index: 1, kind: input, shape index: {}]   ;;  %s1263_s2 = inlined_call_operand.vmem [shape: f32[1,128], index: 2, kind: input, shape index: {}]   ;;  %s1264_s3 = inlined_call_operand.hbm [shape: f32[128,128], index: 3, kind: input, shape index: {}]   ;;  %s1265_s4 = inlined_call_operand.vmem [shape: f32[1,128], index: 4, kind: input, shape index: {}]   ;;  %s1266_s5 = inlined_call_operand.hbm [shape: f32[16,128], index: 5, kind: output, shape index: {}]  }
   0x1   :  { %12 = vsyncpa [#allocation4 + $0x1], 0 }
   0x2   :  { %13 = vsyncpa [#allocation7], 0 }
   0x3   :  { %14 = vsyncpa [#allocation5], 0 }
   0x4   :  { %16 = vsyncpa [#allocation5 + $0x1], 0  ;;  %s1003_s18 = smov 0   ;;  %s1005_s19 = smov 0  }
   0x5   :  { %s1007_s20 = smov 0   ;;  %s1009_s21 = smov 0  }
   0x6 LB: > { %s1024_s22 = sadd.s32 4294967295, %s962_s21   ;;  %s564_s23 = sadd.s32 4294967294, %s962_s21   ;;  %s962_s21 = sphi %s1009_s21, %s1286_s21   ;;  %s958_s20 = sphi %s1007_s20, %s1285_s20   ;;  %s954_s19 = sphi %s1005_s19, %s1284_s19   ;;  %s950_s18 = sphi %s1003_s18, %s1283_s18  }
   0x7   : > { %p42_p0 = scmp.ne.s32.totalorder %s954_s19, %s950_s18  ;;  %p1267_p1 = scmp.eq.s32.totalorder %s1024_s22, 0 }
   0x8   : > { %p156_p3 = scmp.eq.s32.totalorder %s564_s23, 1  ;;  %p565_p5 = scmp.ge.s32.totalorder %s962_s21, 1 }
   0x9   : > { %p1033_p4 = por %p1267_p1, %p42_p0  ;;  %p163_p7 = scmp.lt.s32.totalorder %s962_s21, 3 }
   0xa   : > { %p1038_p6 = por %p156_p3, %p42_p0  ;;  %s964_s27 = smov [#allocation6]  }
   0xb   : > { %s1270_s24 = scalar_select %p1033_p4, 1, 0 }
   0xc   : > { %s1271_s25 = scalar_select %p1038_p6, 1, 0 }
   0xd   : > { %p1043_p8 = pnand %p565_p5, %p163_p7  ;;  %s175_s28 = sshll.u32 %s964_s27, 4  ;;  %s1047_s28 = int_to_ptr.vmem [resolvable:$true] %s175_s28 }
   0xe   : > { %s965_s30 = smov [#allocation8]   ;;  %s806_s9 = scalar_lea.hbm %s1262_s1, 2048 }
   0xf   : > { %p746_p9 = pneg %p1043_p8  ;;  %s191_s6 = sshll.u32 %s965_s30, 4  ;;  %s1058_s6 = int_to_ptr.vmem [resolvable:$true] %s191_s6 }
  0x10   : > { %p807_p12 = scmp.ne.s32.totalorder %s1262_s1, %s806_s9  ;;  %p813_p5 = scmp.lt.u32.totalorder %s806_s9, %s1262_s1 }
  0x11   : > { %p1054_p11 = pnand %p746_p9, %p1267_p1 }
  0x13   : > { %p808_p13 = pneg %p1054_p11 }
  0x15   : > { %p809_p0 = pnand %p808_p13, %p807_p12 }
  0x17   : > { %p810_p3 = pneg %p809_p0 }
  0x19   : > { %p815_p7 = pnand %p813_p5, %p810_p3 }
  0x1b   : > { %818 = shalt.err (!%p815_p7)
}
  0x1c   : > { %s819_s14 = scalar_lea.vmem %s1047_s28, 2048  ;;  %p827_p2 = scmp.lt.s32.totalorder %s1047_s28, %s1047_s28 }
  0x1d   : > { %p820_p9 = scmp.ne.s32.totalorder %s1047_s28, %s819_s14  ;;  %p828_p12 = scmp.lt.s32.totalorder %s819_s14, %s819_s14 }
  0x1f   : > { %p822_p10 = pnand %p820_p9, %p808_p13  ;;  %p829_p0 = por %p828_p12, %p827_p2 }
  0x21   : > { %p823_p1 = pneg %p822_p10 }
  0x23   : > { %p830_p6 = pnand %p829_p0, %p823_p1 }
  0x25   : > { %833 = shalt.err (!%p830_p6)
}
  0x26   : > { %s966_s15 = smov 128   ;;  %s967_s16 = smov 8  }
  0x27   : > { %749 = dma.hbm_to_vmem [thread:$0]  (!%p1054_p11), %s1262_s1, 2048, %s1047_s28, [#allocation7], %s966_s15, %s966_s15, %s967_s16  }
  0x28   : > { %s834_s7 = scalar_lea.hbm %s1264_s3, 2048 }
  0x29   : > { %p835_p2 = scmp.ne.s32.totalorder %s1264_s3, %s834_s7  ;;  %p841_p10 = scmp.lt.u32.totalorder %s834_s7, %s1264_s3 }
  0x2b   : > { %p837_p1 = pnand %p835_p2, %p808_p13 }
  0x2d   : > { %p838_p6 = pneg %p837_p1 }
  0x2f   : > { %p843_p3 = pnand %p841_p10, %p838_p6 }
  0x31   : > { %846 = shalt.err (!%p843_p3)
}
  0x32   : > { %s847_s28 = scalar_lea.vmem %s1058_s6, 2048  ;;  %p855_p12 = scmp.lt.s32.totalorder %s1058_s6, %s1058_s6 }
  0x33   : > { %p848_p5 = scmp.ne.s32.totalorder %s1058_s6, %s847_s28  ;;  %p856_p0 = scmp.lt.s32.totalorder %s847_s28, %s847_s28 }
  0x35   : > { %p850_p7 = pnand %p848_p5, %p808_p13  ;;  %p857_p2 = por %p856_p0, %p855_p12 }
  0x37   : > { %p851_p9 = pneg %p850_p7 }
  0x39   : > { %p858_p1 = pnand %p857_p2, %p851_p9 }
  0x3b   : > { %861 = shalt.err (!%p858_p1)
}
  0x3c   : > { %752 = dma.hbm_to_vmem [thread:$0]  (!%p1054_p11), %s1264_s3, 2048, %s1058_s6, [#allocation7], %s966_s15, %s966_s15, %s967_s16  }
  0x3d   : > { %s1113_s14 = sadd.s32 1, %s962_s21   ;;  %s29_s29 = sadd.s32 1, %s958_s20 }
  0x3e   : > { %s26_s17 = ssub.s32 %s962_s21, %s1113_s14  ;;  %p36_p13 = scmp.ne.s32.totalorder %s958_s20, %s954_s19 }
  0x3f   : > { %p27_p6 = scmp.eq.s32.totalorder %s26_s17, 0  ;;  %p37_p10 = scmp.eq.s32.totalorder %s962_s21, 0 }
  0x40   : > { %p1274_p3 = scmp.eq.s32.totalorder %s1024_s22, 1  ;;  %p763_p7 = scmp.lt.s32.totalorder %s962_s21, 2 }
  0x41   : > { %s1129_s27 = scalar_select %p27_p6, %s958_s20, %s29_s29  }
  0x42   : > { %p1123_p5 = por %p1274_p3, %p36_p13  ;;  %p38_p9 = por %p37_p10, %p36_p13 }
  0x43   : > { %s208_s30 = sand.u32 1, %s958_s20   ;;  %s570_s6 = sshll.u32 %s962_s21, 7 }
  0x44   : > { %s1275_s23 = scalar_select %p1123_p5, 1, 0 }
  0x45   : > { %s569_s7 = sshll.u32 %s208_s30, 3  ;;  %s1136_s8 = scalar_lea.hbm %s1261_s0, %s570_s6 }
  0x46   : > { %s212_s9 = scalar_lea.vmem [#allocation3], %s569_s7  ;;  %p1140_p11 = pnand %p763_p7, %p38_p9 }
  0x47   : > { %s219_s10 = sshll.u32 %s212_s9, 4  ;;  %s209_s28 = scalar_lea.sflag [#allocation4], %s208_s30  ;;  %s1138_s10 = int_to_ptr.vmem [resolvable:$true] %s219_s10 }
  0x48   : > { %s862_s12 = scalar_lea.hbm %s1136_s8, 128  ;;  %p864_p0 = pneg %p1140_p11 }
  0x49   : > { %p863_p12 = scmp.ne.s32.totalorder %s1136_s8, %s862_s12  ;;  %s867_s17 = scalar_lea.hbm %s1261_s0, 256 }
  0x4a   : > { %p868_p13 = scmp.lt.u32.totalorder %s1136_s8, %s1261_s0  ;;  %p869_p6 = scmp.lt.u32.totalorder %s867_s17, %s862_s12 }
  0x4b   : > { %p865_p2 = pnand %p864_p0, %p863_p12  ;;  %p871_p3 = scmp.lt.u32.totalorder %s862_s12, %s1136_s8 }
  0x4c   : > { %p870_p10 = por %p869_p6, %p868_p13 }
  0x4d   : > { %p866_p1 = pneg %p865_p2 }
  0x4e   : > { %p872_p7 = por %p871_p3, %p870_p10 }
  0x50   : > { %p873_p9 = pnand %p872_p7, %p866_p1 }
  0x52   : > { %876 = shalt.err (!%p873_p9)
}
  0x53   : > { %s877_s30 = scalar_lea.vmem %s1138_s10, 128  ;;  %s968_s15 = smov [#allocation3]  }
  0x54   : > { %p878_p12 = scmp.ne.s32.totalorder %s1138_s10, %s877_s30  ;;  %s882_s16 = sshll.u32 %s968_s15, 4  ;;  %s883_s16 = int_to_ptr.vmem [resolvable:$false] %s882_s16 }
  0x55   : > { %s884_s9 = scalar_lea.vmem %s883_s16, 256  ;;  %p885_p4 = scmp.lt.s32.totalorder %s1138_s10, %s883_s16 }
  0x56   : > { %p880_p2 = pnand %p878_p12, %p864_p0  ;;  %p886_p13 = scmp.lt.s32.totalorder %s884_s9, %s877_s30 }
  0x58   : > { %p881_p5 = pneg %p880_p2  ;;  %p887_p6 = por %p886_p13, %p885_p4 }
  0x5a   : > { %p888_p10 = pnand %p887_p6, %p881_p5 }
  0x5c   : > { %891 = shalt.err (!%p888_p10)
}
  0x5d   : > { %756 = dma.hbm_to_vmem [thread:$0]  (!%p1140_p11), %s1136_s8, 128, %s1138_s10, %s209_s28  }
  0x5e   : > { %228 = sbr.rel (%p1043_p8) target bundleno = 585 (0x249), region = 40  ;;  %s1172_s12 = sand.u32 (!%p1043_p8), 1, %s954_s19  }
  0x5f   : > { %s572_s13 = sshll.u32 (!%p1043_p8), %s1172_s12, 3  ;;  %s231_s29 = scalar_lea.sflag (!%p1043_p8), [#allocation4], %s1172_s12 }
  0x60   : > { %s1178_s17 = scalar_lea.vmem (!%p1043_p8), [#allocation3], %s572_s13  ;;  %p1277_p4 = scmp.ne.s32.totalorder (!%p1043_p8), %s1270_s24, 0 }
  0x65   : > { %937 = dma.done.wait (%p1277_p4), %s231_s29, 128  }
  0x66   : > { %939 = vsyncadd (%p1277_p4), %s231_s29, 4294967168  ;;  %p1278_p5 = scmp.eq.s32.totalorder %s1024_s22, 0 }
  0x68   : > { %941 = dma.done.wait (%p1278_p5), [#allocation7], 4096   ;;  %p1279_p8 = pmov %p1278_p5 }
  0x69   : > { %v969_v0 = vmov 0.0|0.0   ;;  %vm970_vm0 = vmmov 0   ;;  %v971_v1 = vmov 0.0   ;;  %v270_v2 = vld [vmem:[#allocation6] sm:$0xff]  ;;  %v271_v3 = vld [vmem:[#allocation6 + $0x8] sm:$0xff]  ;;  %v272_v4 = vld [vmem:[#allocation6 + $0x10] sm:$0xff] }
  0x6a   : > { %943 = vsyncadd (%p1279_p8), [#allocation7], 4294963200  ;;  %686 = vmatprep.subr.bf16.mxu0 %v969_v0  ;;  %648 = vmatprep.mubr.msk.f32.mxu0 %vm970_vm0, %v971_v1  ;;  %v687_v5 = vpack.c.bf16 %v271_v3, %v270_v2  ;;  %v273_v6 = vld [vmem:[#allocation6 + $0x18] sm:$0xff]  ;;  %v274_v8 = vld [vmem:[#allocation6 + $0x20] sm:$0xff]  ;;  %s579_s11 = sshll.u32 %s1024_s22, 7  ;;  %s268_s28 = scalar_lea.vmem [#allocation9], %s572_s13 }
  0x6b   : > { %710 = vmatprep.subr.bf16.mxu1 %v969_v0  ;;  %683 = vmatprep.mubr.msk.f32.mxu1 %vm970_vm0, %v971_v1  ;;  %v690_v7 = vpack.c.bf16 %v273_v6, %v272_v4  ;;  %v275_v9 = vld [vmem:[#allocation6 + $0x28] sm:$0xff]  ;;  %v366_v10 = vld [vmem:[#allocation8] sm:$0xff]  ;;  %v368_v12 = vld [vmem:[#allocation8 + $0x10] sm:$0xff]  ;;  %s475_s7 = sshll.u32 %s268_s28, 4  ;;  %s1217_s15 = scalar_lea.hbm %s1266_s5, %s579_s11  ;;  %s1219_s7 = int_to_ptr.vmem [resolvable:$true] %s475_s7 }
  0x6c   : > { %688 = vmatpush3.bf16.msra.mxu0 %v687_v5  ;;  %v367_v11 = vld [vmem:[#allocation8 + $0x8] sm:$0xff]  ;;  %v369_v13 = vld [vmem:[#allocation8 + $0x18] sm:$0xff]  ;;  %v693_v14 = vpack.c.bf16 %v275_v9, %v274_v8  ;;  %v276_v16 = vld [vmem:[#allocation6 + $0x30] sm:$0xff]  ;;  %s462_s16 = scalar_lea.sflag [#allocation5], %s1172_s12  ;;  %s892_s9 = scalar_lea.vmem %s1219_s7, 128 }
  0x6d   : > { %689 = vmatprep.subr.bf16.mxu0 %v969_v0  ;;  %v711_v15 = vpack.c.bf16 %v367_v11, %v366_v10  ;;  %v277_v17 = vld [vmem:[#allocation6 + $0x38] sm:$0xff]  ;;  %v714_v18 = vpack.c.bf16 %v369_v13, %v368_v12  ;;  %v370_v19 = vld [vmem:[#allocation8 + $0x20] sm:$0xff]  ;;  %v371_v20 = vld [vmem:[#allocation8 + $0x28] sm:$0xff]  ;;  %p893_p11 = scmp.ne.s32.totalorder %s1219_s7, %s892_s9  ;;  %p1280_p0 = scmp.ne.s32.totalorder %s1275_s23, 0 }
  0x6e   : > { %v696_v21 = vpack.c.bf16 %v277_v17, %v276_v16  ;;  %v278_v22 = vld [vmem:[#allocation6 + $0x40] sm:$0xff]  ;;  %v279_v23 = vld [vmem:[#allocation6 + $0x48] sm:$0xff]  ;;  %v717_v24 = vpack.c.bf16 %v371_v20, %v370_v19  ;;  %v372_v25 = vld [vmem:[#allocation8 + $0x30] sm:$0xff]  ;;  %s972_s22 = smov [#allocation9]  }
  0x6f   : > { %712 = vmatpush3.bf16.msra.mxu1 %v711_v15  ;;  %v373_v26 = vld [vmem:[#allocation8 + $0x38] sm:$0xff]  ;;  %v699_v27 = vpack.c.bf16 %v279_v23, %v278_v22  ;;  %v280_v28 = vld [vmem:[#allocation6 + $0x50] sm:$0xff]  ;;  %v374_v31 = vld [vmem:[#allocation8 + $0x40] sm:$0xff]  ;;  %p894_p1 = pnand %p893_p11, %p1280_p0  ;;  %s896_s13 = sshll.u32 %s972_s22, 4  ;;  %s897_s13 = int_to_ptr.vmem [resolvable:$false] %s896_s13 }
  0x70   : > { %691 = vmatpush3.bf16.msra.mxu0 %v690_v7  ;;  %713 = vmatprep.subr.bf16.mxu1 %v969_v0  ;;  %v281_v29 = vld [vmem:[#allocation6 + $0x58] sm:$0xff]  ;;  %v720_v30 = vpack.c.bf16 %v373_v26, %v372_v25  ;;  %v375_v32 = vld [vmem:[#allocation8 + $0x48] sm:$0xff]  ;;  %v282_v34 = vld [vmem:[#allocation6 + $0x60] sm:$0xff]  ;;  %s898_s29 = scalar_lea.vmem %s897_s13, 256  ;;  %p899_p7 = scmp.lt.s32.totalorder %s1219_s7, %s897_s13 }
  0x71   : > { %692 = vmatprep.subr.bf16.mxu0 %v969_v0  ;;  %v702_v33 = vpack.c.bf16 %v281_v29, %v280_v28  ;;  %v283_v35 = vld [vmem:[#allocation6 + $0x68] sm:$0xff]  ;;  %v723_v36 = vpack.c.bf16 %v375_v32, %v374_v31  ;;  %v376_v37 = vld [vmem:[#allocation8 + $0x50] sm:$0xff]  ;;  %v377_v38 = vld [vmem:[#allocation8 + $0x58] sm:$0xff]  ;;  %p895_p3 = pneg %p894_p1  ;;  %p900_p9 = scmp.lt.s32.totalorder %s898_s29, %s892_s9 }
  0x72   : > { %v705_v39 = vpack.c.bf16 %v283_v35, %v282_v34  ;;  %v284_v40 = vld [vmem:[#allocation6 + $0x70] sm:$0xff]  ;;  %v285_v41 = vld [vmem:[#allocation6 + $0x78] sm:$0xff]  ;;  %v726_v42 = vpack.c.bf16 %v377_v38, %v376_v37  ;;  %v378_v43 = vld [vmem:[#allocation8 + $0x60] sm:$0xff] }
  0x73   : > { %715 = vmatpush3.bf16.msra.mxu1 %v714_v18  ;;  %v379_v44 = vld [vmem:[#allocation8 + $0x68] sm:$0xff]  ;;  %v708_v45 = vpack.c.bf16 %v285_v41, %v284_v40  ;;  %v269_v47 = vld [vmem:[%s1178_s17] sm:$0xff]  ;;  %p901_p12 = por %p900_p9, %p899_p7 }
  0x74   : > { %694 = vmatpush3.bf16.msra.mxu0 %v693_v14  ;;  %716 = vmatprep.subr.bf16.mxu1 %v969_v0  ;;  %v729_v46 = vpack.c.bf16 %v379_v44, %v378_v43  ;;  %v380_v48 = vld [vmem:[#allocation8 + $0x70] sm:$0xff]  ;;  %v381_v49 = vld [vmem:[#allocation8 + $0x78] sm:$0xff] }
  0x75   : > { %695 = vmatprep.subr.bf16.mxu0 %v969_v0  ;;  %v732_v50 = vpack.c.bf16 %v381_v49, %v380_v48  ;;  %v576_v51 = vld [vmem:[%s1263_s2] ss:$0 sm:$0xff]  ;;  %p902_p2 = pnand %p901_p12, %p895_p3 }
  0x76   : > { %v577_v56 = vld [vmem:[%s1265_s4] ss:$0 sm:$0xff] }
  0x77   : > { %718 = vmatpush3.bf16.msra.mxu1 %v717_v24 }
  0x78   : > { %697 = vmatpush3.bf16.msra.mxu0 %v696_v21  ;;  %719 = vmatprep.subr.bf16.mxu1 %v969_v0 }
  0x79   : > { %698 = vmatprep.subr.bf16.mxu0 %v969_v0 }
  0x7b   : > { %721 = vmatpush3.bf16.msra.mxu1 %v720_v30 }
  0x7c   : > { %700 = vmatpush3.bf16.msra.mxu0 %v699_v27  ;;  %722 = vmatprep.subr.bf16.mxu1 %v969_v0 }
  0x7d   : > { %701 = vmatprep.subr.bf16.mxu0 %v969_v0 }
  0x7f   : > { %724 = vmatpush3.bf16.msra.mxu1 %v723_v36 }
  0x80   : > { %703 = vmatpush3.bf16.msra.mxu0 %v702_v33  ;;  %725 = vmatprep.subr.bf16.mxu1 %v969_v0 }
  0x81   : > { %704 = vmatprep.subr.bf16.mxu0 %v969_v0 }
  0x83   : > { %727 = vmatpush3.bf16.msra.mxu1 %v726_v42 }
  0x84   : > { %706 = vmatpush3.bf16.msra.mxu0 %v705_v39  ;;  %728 = vmatprep.subr.bf16.mxu1 %v969_v0 }
  0x85   : > { %707 = vmatprep.subr.bf16.mxu0 %v969_v0 }
  0x87   : > { %730 = vmatpush3.bf16.msra.mxu1 %v729_v46 }
  0x88   : > { %709 = vmatpush3.bf16.msra.mxu0 %v708_v45  ;;  %731 = vmatprep.subr.bf16.mxu1 %v969_v0 }
  0x8b   : > { %649 = vmatmul.mubr.f32.vlgmr.msra.gmra.mrb[0].mxu0 %v269_v47  ;;  %733 = vmatpush3.bf16.msra.mxu1 %v732_v50 }
 0x15e   : > { %v359_v52 = vpop.f32.mrb[0].mxu0 }
 0x15f   : > { %v360_v53 = vadd.f32 %v576_v51, %v359_v52  ;;  %v650_v54 = vpop.f32.mrb[1].mxu0 }
 0x161   : > { %v363_v55 = vmax.f32 %v360_v53, 0.0 }
 0x163   : > { %684 = vmatmul.mubr.f32.vlgmr.msra.gmra.mrb[0].mxu1 %v363_v55 }
 0x236   : > { %v455_v57 = vpop.f32.mrb[0].mxu1 }
 0x237   : > { %v456_v58 = vadd.f32 %v577_v56, %v455_v57  ;;  %v685_v59 = vpop.f32.mrb[1].mxu1 }
 0x239   : > { %v459_v60 = vadd.f32 %v456_v58, %v269_v47 }
 0x23b   : > { %460 = vst [vmem:[%s268_s28] sm:$0xff] %v459_v60 }
 0x23c   : > { %905 = shalt.err (!%p902_p2)
}
 0x23d   : > { %s906_s12 = scalar_lea.hbm %s1217_s15, 128  ;;  %s910_s26 = scalar_lea.hbm %s1266_s5, 256 }
 0x23e   : > { %p907_p13 = scmp.ne.s32.totalorder %s1217_s15, %s906_s12  ;;  %p911_p4 = scmp.lt.u32.totalorder %s1217_s15, %s1266_s5 }
 0x23f   : > { %p912_p5 = scmp.lt.u32.totalorder %s910_s26, %s906_s12  ;;  %p914_p11 = scmp.lt.u32.totalorder %s906_s12, %s1217_s15 }
 0x240   : > { %p908_p6 = pnand %p907_p13, %p1280_p0 }
 0x241   : > { %p913_p8 = por %p912_p5, %p911_p4 }
 0x242   : > { %p909_p10 = pneg %p908_p6 }
 0x243   : > { %p915_p1 = por %p914_p11, %p913_p8 }
 0x245   : > { %p916_p3 = pnand %p915_p1, %p909_p10 }
 0x247   : > { %919 = shalt.err (!%p916_p3)
}
 0x248   : > { %744 = dma.vmem_to_hbm [thread:$0]  (%p1280_p0), %s1219_s7, 128, %s1217_s15, %s462_s16  }
 0x249 PF: > { %s487_s11 = sand.u32 1, %s950_s18   ;;  %p1281_p7 = scmp.ne.s32.totalorder %s1271_s25, 0 }
 0x24a   : > { %p1282_p9 = scmp.ge.s32.totalorder %s962_s21, 2  ;;  %s488_s28 = scalar_lea.sflag [#allocation5], %s487_s11 }
 0x24c   : > { %p758_p12 = pnand %p1282_p9, %p1281_p7 }
 0x24e   : > { %945 = dma.done.wait (!%p758_p12), %s488_s28, 128  }
 0x24f   : > { %947 = vsyncadd (!%p758_p12), %s488_s28, 4294967168  ;;  %p19_p2 = scmp.ge.s32.totalorder %s1113_s14, 4   ;;  %s1283_s18 = smov %s954_s19 }
 0x250   : > { %s1284_s19 = smov %s958_s20  ;;  %s1285_s20 = smov %s1129_s27 }
 0x251   : > { %s1286_s21 = smov %s1113_s14  ;;  %21 = sbr.rel (!%p19_p2) target bundleno = 6 (0x6), region = 93 }
 0x258   :  { %493 = vsyncpa [#allocation4], 1 }
 0x259   :  { %495 = vsyncpa [#allocation4 + $0x1], 1 }
 0x25a   :  { %496 = vsyncpa [#allocation7], 1 }
 0x25b   :  { %497 = vsyncpa [#allocation5], 1 }
 0x25c   :  { %499 = vsyncpa [#allocation5 + $0x1], 1 }

</bundles_post_ra>
